<compile_context>
chip_gen: v7x
topology: tpu7x:2x2x1
jax: 0.10.0
libtpu: 0.0.40
codegen_flags: <defaults>
</compile_context>

<pallas_src>
import jax
import jax.numpy as jnp
from jax.experimental import pallas as pl
from jax.experimental.pallas import tpu as pltpu

EPS = 1e-5
LANE = 128


def _round_up(n, m):
    return (n + m - 1) // m * m


def _make_kernel(batch, vec_slices, w145_slices):
    """batch: static batch size (BN statistics divisor).
    vec_slices:  static (start, width) pairs into the packed (1, total) f32
                 vector input, ordered [g1, be1, g2, be2, g3, be3, g4, be4, b5].
    w145_slices: static (start, width) pairs for fc1/fc4/fc5 inside the packed
                 (128, 768) bf16 weight slab.  All offsets are 128-aligned."""
    inv_b = 1.0 / batch
    (g1s, g1w), (b1s, b1w), (g2s, g2w), (b2s, b2w), (g3s, g3w), (b3s, b3w), \
        (g4s, g4w), (b4s, b4w), (b5s, b5w) = vec_slices
    (w1s, w1w), (w4s, w4w), (w5s, w5w) = w145_slices

    def mxu(h, w):
        # MXU matmul: bf16 operands, f32 accumulation.
        return jnp.dot(h.astype(jnp.bfloat16), w,
                       preferred_element_type=jnp.float32)

    def bn_relu(h, vec_ref, gs, gw, bs, bw):
        g = vec_ref[:, gs:gs + gw]                     # (1, N) gamma
        be = vec_ref[:, bs:bs + bw]                    # (1, N) beta
        # One-pass batch statistics (training mode, biased variance): the two
        # XLU reduces are independent and there is no (h - mu) full-tile pass.
        s1 = jnp.sum(h, axis=0, keepdims=True)
        s2 = jnp.sum(h * h, axis=0, keepdims=True)
        mu = s1 * inv_b
        var = s2 * inv_b - mu * mu
        s = g * jax.lax.rsqrt(var + EPS)               # (1, N)  EUP rsqrt
        t = be - mu * s                                # (1, N)
        return jnp.maximum(h * s + t, 0.0)             # folded BN + ReLU

    def kernel(x_ref, w145_ref, vec_ref, w2_hbm, w3_hbm, o_ref,
               w2_buf, w3_buf, sem):
        # Stream fc2 / fc3 weights from HBM behind layer-1 / layer-2 compute.
        cp2 = pltpu.make_async_copy(w2_hbm, w2_buf, sem.at[0])
        cp3 = pltpu.make_async_copy(w3_hbm, w3_buf, sem.at[1])
        cp2.start()
        cp3.start()

        h = x_ref[...]                                 # f32; dropout(p=0) == id

        # fc1 (+ BN + ReLU); hidden-layer biases are dead under training-mode
        # BatchNorm and intentionally omitted.
        h = mxu(h, w145_ref[:, w1s:w1s + w1w])
        h = bn_relu(h, vec_ref, g1s, g1w, b1s, b1w)

        # fc2 (+ BN + ReLU) -- wait only when the weight is actually needed.
        cp2.wait()
        h = mxu(h, w2_buf[...])
        h = bn_relu(h, vec_ref, g2s, g2w, b2s, b2w)

        # fc3 (+ BN + ReLU)
        cp3.wait()
        h = mxu(h, w3_buf[...])
        h = bn_relu(h, vec_ref, g3s, g3w, b3s, b3w)

        # fc4 (+ BN + ReLU)
        h = mxu(h, w145_ref[:, w4s:w4s + w4w])
        h = bn_relu(h, vec_ref, g4s, g4w, b4s, b4w)

        # fc5: plain linear, bias kept (no BN / ReLU).
        h = mxu(h, w145_ref[:, w5s:w5s + w5w])
        o_ref[...] = h + vec_ref[:, b5s:b5s + b5w]

    return kernel


def mlp_head_forward(x, params):
    """x: (B, input_dim) float32.
    params: list of per-layer dicts {"w": (din, dout) f32, "b": (dout,) f32,
    and for hidden layers "gamma"/"beta": (dout,) f32}."""
    B = x.shape[0]
    n_layers = len(params)
    assert n_layers == 5, "kernel is specialized for the 5-layer MLP_head"
    dims = [params[0]["w"].shape[0]] + [p["w"].shape[1] for p in params]
    pdims = [_round_up(d, LANE) for d in dims]
    out_dim = dims[-1]
    # fc1 / fc4 / fc5 share the same padded input width (128 at the default
    # sizes) so their weights pack into one lane-dense slab.
    assert pdims[0] == pdims[3] == pdims[4], "packing requires equal padded din"

    # Lane-pad the input with zeros.
    x_p = jnp.pad(x, ((0, 0), (0, pdims[0] - dims[0])))

    def pad_w(i):
        din, dout = params[i]["w"].shape
        return jnp.pad(params[i]["w"],
                       ((0, pdims[i] - din), (0, pdims[i + 1] - dout)))

    # Packed (128, 512+128+128) bf16 weight slab for fc1/fc4/fc5 -> one DMA.
    w145 = jnp.concatenate([pad_w(0), pad_w(3), pad_w(4)],
                           axis=1).astype(jnp.bfloat16)
    w145_slices = []
    off = 0
    for i in (0, 3, 4):
        w145_slices.append((off, pdims[i + 1]))
        off += pdims[i + 1]

    # fc2 / fc3 weights stay in HBM (pl.ANY) and are streamed in-kernel.
    w2 = pad_w(1).astype(jnp.bfloat16)
    w3 = pad_w(2).astype(jnp.bfloat16)

    # Small per-feature vectors packed into ONE lane-aligned (1, total) row:
    # [g1, be1, g2, be2, g3, be3, g4, be4, b5].  b1..b4 are dead under
    # training-mode BatchNorm and dropped.  gamma = beta = 0 on pad lanes so
    # padded columns stay exactly zero through every layer.
    vec_chunks, vec_slices = [], []
    off = 0
    for i, p in enumerate(params):
        dout = p["w"].shape[1]
        small = (p["gamma"], p["beta"]) if i < n_layers - 1 else (p["b"],)
        for v in small:
            vec_chunks.append(jnp.pad(v, (0, pdims[i + 1] - dout)))
            vec_slices.append((off, pdims[i + 1]))
            off += pdims[i + 1]
    vec = jnp.concatenate(vec_chunks)[None, :]          # offsets % 128 == 0

    vmem = pl.BlockSpec(memory_space=pltpu.MemorySpace.VMEM)
    hbm = pl.BlockSpec(memory_space=pl.ANY)

    flops = 2 * B * sum(pdims[i] * pdims[i + 1] for i in range(n_layers))
    transcendentals = sum(pdims[1:n_layers])             # one rsqrt per BN feat
    bytes_accessed = (int(x_p.size) * 4 + int(w145.size) * 2
                      + int(w2.size) * 2 + int(w3.size) * 2
                      + int(vec.size) * 4 + B * pdims[-1] * 4)

    out_p = pl.pallas_call(
        _make_kernel(B, vec_slices, w145_slices),
        out_shape=jax.ShapeDtypeStruct((B, pdims[-1]), jnp.float32),
        in_specs=[vmem, vmem, vmem, hbm, hbm],
        out_specs=vmem,
        scratch_shapes=[pltpu.VMEM(w2.shape, jnp.bfloat16),
                        pltpu.VMEM(w3.shape, jnp.bfloat16),
                        pltpu.SemaphoreType.DMA((2,))],
        cost_estimate=pl.CostEstimate(flops=flops,
                                      transcendentals=transcendentals,
                                      bytes_accessed=bytes_accessed),
    )(x_p, w145, vec, w2, w3)

    # TODO(synk): for large B add a batch-tiled grid with two-phase BN
    # (full-batch sum / sum-of-squares in VMEM scratch); on v7x, splitting the
    # batch across both TensorCores additionally needs a cross-core partial
    # reduction (VMEM_SHARED/CMEM + core barrier) before the scale/shift --
    # or split the feature axis per layer so BN statistics stay core-local.
    # At B=8 a single grid-less call is latency-optimal.
    return out_p[:, :out_dim]


def init_params(key, input_dim, output_dim, l1=512, l2=256, l3=128, l4=64):
    """Deterministic synthetic parameters (Kaiming-uniform-ish linears, biases
    included for PyTorch fidelity; gamma=1 / beta=0 matching nn.BatchNorm1d)."""
    dims = [input_dim, l1, l2, l3, l4, output_dim]
    keys = jax.random.split(key, 2 * (len(dims) - 1))
    params = []
    for i in range(len(dims) - 1):
        din, dout = dims[i], dims[i + 1]
        bound = 1.0 / (din ** 0.5)
        p = {"w": jax.random.uniform(keys[2 * i], (din, dout), jnp.float32,
                                     -bound, bound),
             "b": jax.random.uniform(keys[2 * i + 1], (dout,), jnp.float32,
                                     -bound, bound)}
        if i < len(dims) - 2:
            p["gamma"] = jnp.ones((dout,), jnp.float32)
            p["beta"] = jnp.zeros((dout,), jnp.float32)
        params.append(p)
    return params


def reference_forward(x, params):
    """Plain-JAX reference mirroring the PyTorch forward (ALL biases applied,
    unfolded two-pass BatchNorm).  Matmuls use the same bf16-operand /
    f32-accumulate precision policy as the kernel so tolerances stay tight."""
    h = x
    for i, p in enumerate(params):
        h = jnp.dot(h.astype(jnp.bfloat16), p["w"].astype(jnp.bfloat16),
                    preferred_element_type=jnp.float32) + p["b"]
        if i < len(params) - 1:
            mu = jnp.mean(h, axis=0, keepdims=True)
            var = jnp.mean((h - mu) ** 2, axis=0, keepdims=True)
            h = (h - mu) * jax.lax.rsqrt(var + EPS) * p["gamma"] + p["beta"]
            h = jnp.maximum(h, 0.0)
    return h


if __name__ == "__main__":
    key = jax.random.PRNGKey(0)
    kx, kp = jax.random.split(key)

    B, input_dim, output_dim = 8, 32, 16
    x = jax.random.normal(kx, (B, input_dim), jnp.float32)
    params = init_params(kp, input_dim, output_dim)

    out = jax.block_until_ready(mlp_head_forward(x, params))
    ref = reference_forward(x, params)

    assert out.shape == (B, output_dim)
    # Tolerance accounts for bf16 rounding of weights/activations at the MXU
    # (reference and kernel differ only in fusion order, one-pass vs two-pass
    # variance, and dead-bias handling).
    assert jnp.allclose(out, ref, atol=1e-2, rtol=1e-2), \
        float(jnp.max(jnp.abs(out - ref)))

    print("KERNEL_OK")
</pallas_src>

<mosaic_0001>
module attributes {stable_mosaic.version = 11 : i64} {
  func.func @kernel(%arg0: memref<8x128xf32, #tpu.memory_space<vmem>>, %arg1: memref<128x768xbf16, #tpu.memory_space<vmem>>, %arg2: memref<1x2176xf32, #tpu.memory_space<vmem>>, %arg3: memref<512x256xbf16, #tpu.memory_space<any>>, %arg4: memref<256x128xbf16, #tpu.memory_space<any>>, %arg5: memref<8x128xf32, #tpu.memory_space<vmem>>, %arg6: memref<512x256xbf16, #tpu.memory_space<vmem>>, %arg7: memref<256x128xbf16, #tpu.memory_space<vmem>>, %arg8: memref<2x!tpu.dma_semaphore, #tpu.memory_space<semaphore_mem>>) attributes {dimension_semantics = [], scalar_prefetch = 0 : i64, scratch_operands = 3 : i64, tpu.core_type = #tpu.core_type<tc>} {
    %c0_i32 = arith.constant 0 : i32
    %0 = tpu.memref_slice %arg8[%c0_i32] : memref<2x!tpu.dma_semaphore, #tpu.memory_space<semaphore_mem>> -> memref<1x!tpu.dma_semaphore, #tpu.memory_space<semaphore_mem>>
    %1 = tpu.memref_squeeze %0 : memref<1x!tpu.dma_semaphore, #tpu.memory_space<semaphore_mem>> -> memref<!tpu.dma_semaphore, #tpu.memory_space<semaphore_mem>>
    tpu.enqueue_dma source(%arg3 : memref<512x256xbf16, #tpu.memory_space<any>>) target(%arg6 : memref<512x256xbf16, #tpu.memory_space<vmem>>) target_semaphore(%1 : memref<!tpu.dma_semaphore, #tpu.memory_space<semaphore_mem>>)
    %c1_i32 = arith.constant 1 : i32
    %2 = tpu.memref_slice %arg8[%c1_i32] : memref<2x!tpu.dma_semaphore, #tpu.memory_space<semaphore_mem>> -> memref<1x!tpu.dma_semaphore, #tpu.memory_space<semaphore_mem>>
    %3 = tpu.memref_squeeze %2 : memref<1x!tpu.dma_semaphore, #tpu.memory_space<semaphore_mem>> -> memref<!tpu.dma_semaphore, #tpu.memory_space<semaphore_mem>>
    tpu.enqueue_dma source(%arg4 : memref<256x128xbf16, #tpu.memory_space<any>>) target(%arg7 : memref<256x128xbf16, #tpu.memory_space<vmem>>) target_semaphore(%3 : memref<!tpu.dma_semaphore, #tpu.memory_space<semaphore_mem>>)
    %c0 = arith.constant 0 : index
    %c0_0 = arith.constant 0 : index
    %4 = vector.load %arg0[%c0, %c0_0] : memref<8x128xf32, #tpu.memory_space<vmem>>, vector<8x128xf32>
    %c0_1 = arith.constant 0 : index
    %c0_2 = arith.constant 0 : index
    %5 = vector.load %arg1[%c0_1, %c0_2] : memref<128x768xbf16, #tpu.memory_space<vmem>>, vector<128x512xbf16>
    %6 = arith.truncf %4 : vector<8x128xf32> to vector<8x128xbf16>
    %cst = arith.constant dense<0.000000e+00> : vector<8x512xf32>
    %7 = tpu.matmul %6, %5, %cst {dimension_numbers = #tpu.dot_dimension_numbers<[1], [0], [0], [1], [0, 0, 1, 1], [], []>} : vector<8x128xbf16>, vector<128x512xbf16>, vector<8x512xf32> -> vector<8x512xf32>
    %c0_3 = arith.constant 0 : index
    %c0_4 = arith.constant 0 : index
    %8 = vector.load %arg2[%c0_3, %c0_4] : memref<1x2176xf32, #tpu.memory_space<vmem>>, vector<1x512xf32>
    %c0_5 = arith.constant 0 : index
    %c512 = arith.constant 512 : index
    %9 = vector.load %arg2[%c0_5, %c512] : memref<1x2176xf32, #tpu.memory_space<vmem>>, vector<1x512xf32>
    %cst_6 = arith.constant dense<0.000000e+00> : vector<512xf32>
    %10 = vector.multi_reduction <add>, %7, %cst_6 [0] : vector<8x512xf32> to vector<512xf32>
    %11 = vector.shape_cast %10 : vector<512xf32> to vector<1x512xf32>
    %12 = arith.mulf %7, %7 : vector<8x512xf32>
    %cst_7 = arith.constant dense<0.000000e+00> : vector<512xf32>
    %13 = vector.multi_reduction <add>, %12, %cst_7 [0] : vector<8x512xf32> to vector<512xf32>
    %14 = vector.shape_cast %13 : vector<512xf32> to vector<1x512xf32>
    %cst_8 = arith.constant 1.250000e-01 : f32
    %15 = vector.broadcast %cst_8 : f32 to vector<1x512xf32>
    %16 = arith.mulf %11, %15 : vector<1x512xf32>
    %cst_9 = arith.constant 1.250000e-01 : f32
    %17 = vector.broadcast %cst_9 : f32 to vector<1x512xf32>
    %18 = arith.mulf %14, %17 : vector<1x512xf32>
    %19 = arith.mulf %16, %16 : vector<1x512xf32>
    %20 = arith.subf %18, %19 : vector<1x512xf32>
    %cst_10 = arith.constant 9.99999974E-6 : f32
    %21 = vector.broadcast %cst_10 : f32 to vector<1x512xf32>
    %22 = arith.addf %20, %21 : vector<1x512xf32>
    %23 = math.rsqrt %22 : vector<1x512xf32>
    %24 = arith.mulf %8, %23 : vector<1x512xf32>
    %25 = arith.mulf %16, %24 : vector<1x512xf32>
    %26 = arith.subf %9, %25 : vector<1x512xf32>
    %27 = vector.broadcast %24 : vector<1x512xf32> to vector<8x512xf32>
    %28 = arith.mulf %7, %27 : vector<8x512xf32>
    %29 = vector.broadcast %26 : vector<1x512xf32> to vector<8x512xf32>
    %30 = arith.addf %28, %29 : vector<8x512xf32>
    %cst_11 = arith.constant 0.000000e+00 : f32
    %31 = vector.broadcast %cst_11 : f32 to vector<8x512xf32>
    %32 = arith.maximumf %30, %31 : vector<8x512xf32>
    %c0_i32_12 = arith.constant 0 : i32
    %33 = tpu.memref_slice %arg8[%c0_i32_12] : memref<2x!tpu.dma_semaphore, #tpu.memory_space<semaphore_mem>> -> memref<1x!tpu.dma_semaphore, #tpu.memory_space<semaphore_mem>>
    %34 = tpu.memref_squeeze %33 : memref<1x!tpu.dma_semaphore, #tpu.memory_space<semaphore_mem>> -> memref<!tpu.dma_semaphore, #tpu.memory_space<semaphore_mem>>
    tpu.wait_dma2 semaphore(%34 : memref<!tpu.dma_semaphore, #tpu.memory_space<semaphore_mem>>) src(%arg3 : memref<512x256xbf16, #tpu.memory_space<any>>) dst(%arg6 : memref<512x256xbf16, #tpu.memory_space<vmem>>)
    %c0_13 = arith.constant 0 : index
    %c0_14 = arith.constant 0 : index
    %35 = vector.load %arg6[%c0_13, %c0_14] : memref<512x256xbf16, #tpu.memory_space<vmem>>, vector<512x256xbf16>
    %36 = arith.truncf %32 : vector<8x512xf32> to vector<8x512xbf16>
    %cst_15 = arith.constant dense<0.000000e+00> : vector<8x256xf32>
    %37 = tpu.matmul %36, %35, %cst_15 {dimension_numbers = #tpu.dot_dimension_numbers<[1], [0], [0], [1], [0, 0, 1, 1], [], []>} : vector<8x512xbf16>, vector<512x256xbf16>, vector<8x256xf32> -> vector<8x256xf32>
    %c0_16 = arith.constant 0 : index
    %c1024 = arith.constant 1024 : index
    %38 = vector.load %arg2[%c0_16, %c1024] : memref<1x2176xf32, #tpu.memory_space<vmem>>, vector<1x256xf32>
    %c0_17 = arith.constant 0 : index
    %c1280 = arith.constant 1280 : index
    %39 = vector.load %arg2[%c0_17, %c1280] : memref<1x2176xf32, #tpu.memory_space<vmem>>, vector<1x256xf32>
    %cst_18 = arith.constant dense<0.000000e+00> : vector<256xf32>
    %40 = vector.multi_reduction <add>, %37, %cst_18 [0] : vector<8x256xf32> to vector<256xf32>
    %41 = vector.shape_cast %40 : vector<256xf32> to vector<1x256xf32>
    %42 = arith.mulf %37, %37 : vector<8x256xf32>
    %cst_19 = arith.constant dense<0.000000e+00> : vector<256xf32>
    %43 = vector.multi_reduction <add>, %42, %cst_19 [0] : vector<8x256xf32> to vector<256xf32>
    %44 = vector.shape_cast %43 : vector<256xf32> to vector<1x256xf32>
    %cst_20 = arith.constant 1.250000e-01 : f32
    %45 = vector.broadcast %cst_20 : f32 to vector<1x256xf32>
    %46 = arith.mulf %41, %45 : vector<1x256xf32>
    %cst_21 = arith.constant 1.250000e-01 : f32
    %47 = vector.broadcast %cst_21 : f32 to vector<1x256xf32>
    %48 = arith.mulf %44, %47 : vector<1x256xf32>
    %49 = arith.mulf %46, %46 : vector<1x256xf32>
    %50 = arith.subf %48, %49 : vector<1x256xf32>
    %cst_22 = arith.constant 9.99999974E-6 : f32
    %51 = vector.broadcast %cst_22 : f32 to vector<1x256xf32>
    %52 = arith.addf %50, %51 : vector<1x256xf32>
    %53 = math.rsqrt %52 : vector<1x256xf32>
    %54 = arith.mulf %38, %53 : vector<1x256xf32>
    %55 = arith.mulf %46, %54 : vector<1x256xf32>
    %56 = arith.subf %39, %55 : vector<1x256xf32>
    %57 = vector.broadcast %54 : vector<1x256xf32> to vector<8x256xf32>
    %58 = arith.mulf %37, %57 : vector<8x256xf32>
    %59 = vector.broadcast %56 : vector<1x256xf32> to vector<8x256xf32>
    %60 = arith.addf %58, %59 : vector<8x256xf32>
    %cst_23 = arith.constant 0.000000e+00 : f32
    %61 = vector.broadcast %cst_23 : f32 to vector<8x256xf32>
    %62 = arith.maximumf %60, %61 : vector<8x256xf32>
    %c1_i32_24 = arith.constant 1 : i32
    %63 = tpu.memref_slice %arg8[%c1_i32_24] : memref<2x!tpu.dma_semaphore, #tpu.memory_space<semaphore_mem>> -> memref<1x!tpu.dma_semaphore, #tpu.memory_space<semaphore_mem>>
    %64 = tpu.memref_squeeze %63 : memref<1x!tpu.dma_semaphore, #tpu.memory_space<semaphore_mem>> -> memref<!tpu.dma_semaphore, #tpu.memory_space<semaphore_mem>>
    tpu.wait_dma2 semaphore(%64 : memref<!tpu.dma_semaphore, #tpu.memory_space<semaphore_mem>>) src(%arg4 : memref<256x128xbf16, #tpu.memory_space<any>>) dst(%arg7 : memref<256x128xbf16, #tpu.memory_space<vmem>>)
    %c0_25 = arith.constant 0 : index
    %c0_26 = arith.constant 0 : index
    %65 = vector.load %arg7[%c0_25, %c0_26] : memref<256x128xbf16, #tpu.memory_space<vmem>>, vector<256x128xbf16>
    %66 = arith.truncf %62 : vector<8x256xf32> to vector<8x256xbf16>
    %cst_27 = arith.constant dense<0.000000e+00> : vector<8x128xf32>
    %67 = tpu.matmul %66, %65, %cst_27 {dimension_numbers = #tpu.dot_dimension_numbers<[1], [0], [0], [1], [0, 0, 1, 1], [], []>} : vector<8x256xbf16>, vector<256x128xbf16>, vector<8x128xf32> -> vector<8x128xf32>
    %c0_28 = arith.constant 0 : index
    %c1536 = arith.constant 1536 : index
    %68 = vector.load %arg2[%c0_28, %c1536] : memref<1x2176xf32, #tpu.memory_space<vmem>>, vector<1x128xf32>
    %c0_29 = arith.constant 0 : index
    %c1664 = arith.constant 1664 : index
    %69 = vector.load %arg2[%c0_29, %c1664] : memref<1x2176xf32, #tpu.memory_space<vmem>>, vector<1x128xf32>
    %cst_30 = arith.constant dense<0.000000e+00> : vector<128xf32>
    %70 = vector.multi_reduction <add>, %67, %cst_30 [0] : vector<8x128xf32> to vector<128xf32>
    %71 = vector.shape_cast %70 : vector<128xf32> to vector<1x128xf32>
    %72 = arith.mulf %67, %67 : vector<8x128xf32>
    %cst_31 = arith.constant dense<0.000000e+00> : vector<128xf32>
    %73 = vector.multi_reduction <add>, %72, %cst_31 [0] : vector<8x128xf32> to vector<128xf32>
    %74 = vector.shape_cast %73 : vector<128xf32> to vector<1x128xf32>
    %cst_32 = arith.constant 1.250000e-01 : f32
    %75 = vector.broadcast %cst_32 : f32 to vector<1x128xf32>
    %76 = arith.mulf %71, %75 : vector<1x128xf32>
    %cst_33 = arith.constant 1.250000e-01 : f32
    %77 = vector.broadcast %cst_33 : f32 to vector<1x128xf32>
    %78 = arith.mulf %74, %77 : vector<1x128xf32>
    %79 = arith.mulf %76, %76 : vector<1x128xf32>
    %80 = arith.subf %78, %79 : vector<1x128xf32>
    %cst_34 = arith.constant 9.99999974E-6 : f32
    %81 = vector.broadcast %cst_34 : f32 to vector<1x128xf32>
    %82 = arith.addf %80, %81 : vector<1x128xf32>
    %83 = math.rsqrt %82 : vector<1x128xf32>
    %84 = arith.mulf %68, %83 : vector<1x128xf32>
    %85 = arith.mulf %76, %84 : vector<1x128xf32>
    %86 = arith.subf %69, %85 : vector<1x128xf32>
    %87 = vector.broadcast %84 : vector<1x128xf32> to vector<8x128xf32>
    %88 = arith.mulf %67, %87 : vector<8x128xf32>
    %89 = vector.broadcast %86 : vector<1x128xf32> to vector<8x128xf32>
    %90 = arith.addf %88, %89 : vector<8x128xf32>
    %cst_35 = arith.constant 0.000000e+00 : f32
    %91 = vector.broadcast %cst_35 : f32 to vector<8x128xf32>
    %92 = arith.maximumf %90, %91 : vector<8x128xf32>
    %c0_36 = arith.constant 0 : index
    %c512_37 = arith.constant 512 : index
    %93 = vector.load %arg1[%c0_36, %c512_37] : memref<128x768xbf16, #tpu.memory_space<vmem>>, vector<128x128xbf16>
    %94 = arith.truncf %92 : vector<8x128xf32> to vector<8x128xbf16>
    %cst_38 = arith.constant dense<0.000000e+00> : vector<8x128xf32>
    %95 = tpu.matmul %94, %93, %cst_38 {dimension_numbers = #tpu.dot_dimension_numbers<[1], [0], [0], [1], [0, 0, 1, 1], [], []>} : vector<8x128xbf16>, vector<128x128xbf16>, vector<8x128xf32> -> vector<8x128xf32>
    %c0_39 = arith.constant 0 : index
    %c1792 = arith.constant 1792 : index
    %96 = vector.load %arg2[%c0_39, %c1792] : memref<1x2176xf32, #tpu.memory_space<vmem>>, vector<1x128xf32>
    %c0_40 = arith.constant 0 : index
    %c1920 = arith.constant 1920 : index
    %97 = vector.load %arg2[%c0_40, %c1920] : memref<1x2176xf32, #tpu.memory_space<vmem>>, vector<1x128xf32>
    %cst_41 = arith.constant dense<0.000000e+00> : vector<128xf32>
    %98 = vector.multi_reduction <add>, %95, %cst_41 [0] : vector<8x128xf32> to vector<128xf32>
    %99 = vector.shape_cast %98 : vector<128xf32> to vector<1x128xf32>
    %100 = arith.mulf %95, %95 : vector<8x128xf32>
    %cst_42 = arith.constant dense<0.000000e+00> : vector<128xf32>
    %101 = vector.multi_reduction <add>, %100, %cst_42 [0] : vector<8x128xf32> to vector<128xf32>
    %102 = vector.shape_cast %101 : vector<128xf32> to vector<1x128xf32>
    %cst_43 = arith.constant 1.250000e-01 : f32
    %103 = vector.broadcast %cst_43 : f32 to vector<1x128xf32>
    %104 = arith.mulf %99, %103 : vector<1x128xf32>
    %cst_44 = arith.constant 1.250000e-01 : f32
    %105 = vector.broadcast %cst_44 : f32 to vector<1x128xf32>
    %106 = arith.mulf %102, %105 : vector<1x128xf32>
    %107 = arith.mulf %104, %104 : vector<1x128xf32>
    %108 = arith.subf %106, %107 : vector<1x128xf32>
    %cst_45 = arith.constant 9.99999974E-6 : f32
    %109 = vector.broadcast %cst_45 : f32 to vector<1x128xf32>
    %110 = arith.addf %108, %109 : vector<1x128xf32>
    %111 = math.rsqrt %110 : vector<1x128xf32>
    %112 = arith.mulf %96, %111 : vector<1x128xf32>
    %113 = arith.mulf %104, %112 : vector<1x128xf32>
    %114 = arith.subf %97, %113 : vector<1x128xf32>
    %115 = vector.broadcast %112 : vector<1x128xf32> to vector<8x128xf32>
    %116 = arith.mulf %95, %115 : vector<8x128xf32>
    %117 = vector.broadcast %114 : vector<1x128xf32> to vector<8x128xf32>
    %118 = arith.addf %116, %117 : vector<8x128xf32>
    %cst_46 = arith.constant 0.000000e+00 : f32
    %119 = vector.broadcast %cst_46 : f32 to vector<8x128xf32>
    %120 = arith.maximumf %118, %119 : vector<8x128xf32>
    %c0_47 = arith.constant 0 : index
    %c640 = arith.constant 640 : index
    %121 = vector.load %arg1[%c0_47, %c640] : memref<128x768xbf16, #tpu.memory_space<vmem>>, vector<128x128xbf16>
    %122 = arith.truncf %120 : vector<8x128xf32> to vector<8x128xbf16>
    %cst_48 = arith.constant dense<0.000000e+00> : vector<8x128xf32>
    %123 = tpu.matmul %122, %121, %cst_48 {dimension_numbers = #tpu.dot_dimension_numbers<[1], [0], [0], [1], [0, 0, 1, 1], [], []>} : vector<8x128xbf16>, vector<128x128xbf16>, vector<8x128xf32> -> vector<8x128xf32>
    %c0_49 = arith.constant 0 : index
    %c2048 = arith.constant 2048 : index
    %124 = vector.load %arg2[%c0_49, %c2048] : memref<1x2176xf32, #tpu.memory_space<vmem>>, vector<1x128xf32>
    %125 = vector.broadcast %124 : vector<1x128xf32> to vector<8x128xf32>
    %126 = arith.addf %123, %125 : vector<8x128xf32>
    %c0_50 = arith.constant 0 : index
    %c0_51 = arith.constant 0 : index
    %127 = vector.load %arg5[%c0_50, %c0_51] : memref<8x128xf32, #tpu.memory_space<vmem>>, vector<8x128xf32>
    tpu.vector_store %arg5[%c0_50, %c0_51], %126 {strides = array<i32>} : memref<8x128xf32, #tpu.memory_space<vmem>>, vector<8x128xf32>,
    return
  }
}

</mosaic_0001>

<bundles_post_ra>
// kernel: tpu_custom_call.1
= control target key start
LH: loop header
LB: loop body
LE: loop exit
PB: predicated region body
PF: predicated region fallthrough
CT: control target
= control target key end

     0   :  { %10 = vsyncpa [#allocation6], 0  ;;  %s1785_s0 = inlined_call_operand.hbm [shape: f32[8,128], index: 0, kind: input, shape index: {}]   ;;  %s1786_s1 = inlined_call_operand.hbm [shape: bf16[128,768], index: 1, kind: input, shape index: {}]   ;;  %s1787_s2 = inlined_call_operand.hbm [shape: f32[1,2176], index: 2, kind: input, shape index: {}]   ;;  %s1788_s3 = inlined_call_operand.hbm [shape: bf16[512,256], index: 3, kind: input, shape index: {}]   ;;  %s1789_s4 = inlined_call_operand.hbm [shape: bf16[256,128], index: 4, kind: input, shape index: {}]   ;;  %s1790_s5 = inlined_call_operand.hbm [shape: f32[8,128], index: 5, kind: output, shape index: {}]  }
   0x1   :  { %11 = vsyncpa [#allocation9], 0 }
   0x2   :  { %12 = vsyncpa [#allocation7], 0  ;;  %s1579_s18 = smov [#allocation8]   ;;  %s1459_s22 = scalar_lea.hbm %s1786_s1, 6144 }
   0x3   :  { %s28_s19 = sshll.u32 %s1579_s18, 4  ;;  %p1460_p0 = scmp.ne.s32.totalorder %s1786_s1, %s1459_s22  ;;  %s29_s19 = int_to_ptr.vmem [resolvable:$true] %s28_s19 }
   0x4   :  { %p1463_p1 = scmp.lt.u32.totalorder %s1459_s22, %s1786_s1 }
   0x6   :  { %p1465_p2 = pnand %p1463_p1, %p1460_p0 }
   0x8   :  { %1468 = shalt.err (!%p1465_p2)
}
   0x9   :  { %s1469_s27 = scalar_lea.vmem %s29_s19, 6144  ;;  %p1474_p4 = scmp.lt.s32.totalorder %s29_s19, %s29_s19 }
   0xa   :  { %p1470_p3 = scmp.ne.s32.totalorder %s29_s19, %s1469_s27  ;;  %p1475_p5 = scmp.lt.s32.totalorder %s1469_s27, %s1469_s27 }
   0xc   :  { %p1476_p6 = por %p1475_p5, %p1474_p4 }
   0xe   :  { %p1477_p7 = pnand %p1476_p6, %p1470_p3 }
  0x10   :  { %1480 = shalt.err (!%p1477_p7)
}
  0x11   :  { %s1580_s28 = smov 384   ;;  %s1581_s29 = smov 24  }
  0x12   :  { %34 = dma.hbm_to_vmem [thread:$0]  %s1786_s1, 6144, %s29_s19, [#allocation9], %s1580_s28, %s1580_s28, %s1581_s29  }
  0x13   :  { %s1582_s7 = smov [#allocation5]   ;;  %s1583_s9 = smov [#allocation10]  }
  0x14   :  { %s19_s8 = sshll.u32 %s1582_s7, 4  ;;  %s41_s10 = sshll.u32 %s1583_s9, 4  ;;  %s20_s8 = int_to_ptr.vmem [resolvable:$true] %s19_s8  ;;  %s42_s10 = int_to_ptr.vmem [resolvable:$true] %s41_s10 }
  0x15   :  { %s1481_s13 = scalar_lea.hbm %s1785_s0, 128 }
  0x16   :  { %p1482_p8 = scmp.ne.s32.totalorder %s1785_s0, %s1481_s13  ;;  %p1485_p9 = scmp.lt.u32.totalorder %s1481_s13, %s1785_s0 }
  0x18   :  { %p1487_p10 = pnand %p1485_p9, %p1482_p8 }
  0x1a   :  { %1490 = shalt.err (!%p1487_p10)
}
  0x1b   :  { %s1491_s1 = scalar_lea.vmem %s20_s8, 128  ;;  %p1496_p12 = scmp.lt.s32.totalorder %s20_s8, %s20_s8 }
  0x1c   :  { %p1492_p11 = scmp.ne.s32.totalorder %s20_s8, %s1491_s1  ;;  %p1497_p13 = scmp.lt.s32.totalorder %s1491_s1, %s1491_s1 }
  0x1e   :  { %p1498_p0 = por %p1497_p13, %p1496_p12 }
  0x20   :  { %p1499_p1 = pnand %p1498_p0, %p1492_p11 }
  0x22   :  { %1502 = shalt.err (!%p1499_p1)
}
  0x23   :  { %22 = dma.hbm_to_vmem [thread:$0]  %s1785_s0, 128, %s20_s8, [#allocation6]  }
  0x24   :  { %s1503_s22 = scalar_lea.hbm %s1787_s2, 272 }
  0x25   :  { %p1504_p2 = scmp.ne.s32.totalorder %s1787_s2, %s1503_s22  ;;  %p1507_p3 = scmp.lt.u32.totalorder %s1503_s22, %s1787_s2 }
  0x27   :  { %p1509_p4 = pnand %p1507_p3, %p1504_p2 }
  0x29   :  { %1512 = shalt.err (!%p1509_p4)
}
  0x2a   :  { %s1513_s27 = scalar_lea.vmem %s42_s10, 272  ;;  %s1517_s28 = scalar_lea.vmem %s42_s10, 288 }
  0x2b   :  { %p1514_p5 = scmp.ne.s32.totalorder %s42_s10, %s1513_s27  ;;  %p1518_p6 = scmp.lt.s32.totalorder %s42_s10, %s42_s10 }
  0x2c   :  { %p1519_p7 = scmp.lt.s32.totalorder %s1517_s28, %s1513_s27 }
  0x2e   :  { %p1520_p8 = por %p1519_p7, %p1518_p6 }
  0x30   :  { %p1521_p9 = pnand %p1520_p8, %p1514_p5 }
  0x32   :  { %1524 = shalt.err (!%p1521_p9)
}
  0x33   :  { %44 = dma.hbm_to_vmem [thread:$0]  %s1787_s2, 272, %s42_s10, [#allocation9]  }
  0x34   :  { %1569 = dma.done.wait [#allocation6], 128  }
  0x35   :  { %1570 = vsyncadd [#allocation6], 4294967168 }
  0x36   :  { %1571 = dma.done.wait [#allocation9], 6416  }
  0x37   :  { %1572 = vsyncadd [#allocation9], 4294960880  ;;  %s59_s30 = sld [smem:[#allocation0]]   ;;  %s1584_s6 = smov 256   ;;  %v1585_v0 = vmov 0  }
  0x38   :  { %71 = sst [smem:[#allocation13]] %s1584_s6  ;;  %328 = vmatprep.mubr.bf16.mxu0 %v1585_v0  ;;  %369 = vmatprep.mubr.bf16.mxu1 %v1585_v0  ;;  %s1586_s7 = smov 2  }
  0x39   :  { %73 = sst [smem:[#allocation13 + $0x1]] %s1584_s6  ;;  %s1587_s8 = smov 64  }
  0x3a   :  { %75 = sst [smem:[#allocation13 + $0x2]] %s1586_s7  ;;  %s1588_s9 = smov 128  }
  0x3b   :  { %77 = sst [smem:[#allocation13 + $0x3]] %s1587_s8  ;;  %s1589_s11 = smov [#allocation2]  }
  0x3c   :  { %79 = sst [smem:[#allocation13 + $0x4]] %s1588_s9  ;;  %s67_s2 = sshll.u32 %s1589_s11, 4  ;;  %s68_s2 = int_to_ptr.vmem [resolvable:$true] %s67_s2 }
  0x3d   :  { %81 = sst [smem:[#allocation13 + $0x5]] %s1586_s7  ;;  %s1223_s10 = sshll.u32 %s59_s30, 26 }
  0x3e   :  { %83 = sst [smem:[#allocation13 + $0x6]] %s1588_s9  ;;  %s1224_s12 = sadd.s32 134217728, %s1223_s10 }
  0x3f   :  { %85 = sst [smem:[#allocation13 + $0x7]] %s1587_s8  ;;  %s1590_s13 = smov 4  }
  0x40   :  { %87 = sst [smem:[#allocation13 + $0x8]] %s1590_s13  ;;  %s1591_s14 = smov [#allocation4]  }
  0x41   :  { %s1592_s15 = smov [#allocation12]   ;;  %s1525_s20 = scalar_lea.hbm %s1789_s4, 2048 }
  0x42   :  { %89 = dma.general %s1788_s3, 8192, %s68_s2, %s1591_s14, %s1592_s15, [#allocation13], %s1224_s12, 0  }
  0x43   :  { %v1379_v1 = vld [vmem:[#allocation8 + $0x4] ss:$24 sps:$4 sm:$0xff]   ;;  %v1383_v3 = vld [vmem:[#allocation8] ss:$24 sps:$4 sm:$0xff]   ;;  %v1385_v5 = vld [vmem:[#allocation8 + $0x34] ss:$24 sps:$4 sm:$0xff]   ;;  %p1526_p10 = scmp.ne.s32.totalorder %s1789_s4, %s1525_s20  ;;  %p1529_p11 = scmp.lt.u32.totalorder %s1525_s20, %s1789_s4 }
  0x44   :  { %v1381_v2 = vld [vmem:[#allocation8 + $0xc] ss:$24 sps:$4 sm:$0xff]   ;;  %296 = vmatprep.subr.bf16.mxu0 %v1379_v1  ;;  %v1384_v4 = vld [vmem:[#allocation8 + $0x8] ss:$24 sps:$4 sm:$0xff]   ;;  %v1387_v6 = vld [vmem:[#allocation8 + $0x3c] ss:$24 sps:$4 sm:$0xff]  }
  0x45   :  { %337 = vmatprep.subr.bf16.mxu1 %v1381_v2  ;;  %297 = vmatpush1.bf16.msra.mxu0 %v1383_v3  ;;  %v1389_v7 = vld [vmem:[#allocation8 + $0x30] ss:$24 sps:$4 sm:$0xff]   ;;  %v1391_v9 = vld [vmem:[#allocation8 + $0x64] ss:$24 sps:$4 sm:$0xff]   ;;  %v1395_v11 = vld [vmem:[#allocation8 + $0x60] ss:$24 sps:$4 sm:$0xff]   ;;  %p1531_p12 = pnand %p1529_p11, %p1526_p10 }
  0x46   :  { %338 = vmatpush1.bf16.msra.mxu1 %v1384_v4  ;;  %298 = vmatprep.subr.bf16.mxu0 %v1385_v5  ;;  %v1390_v8 = vld [vmem:[#allocation8 + $0x38] ss:$24 sps:$4 sm:$0xff]   ;;  %v1393_v10 = vld [vmem:[#allocation8 + $0x6c] ss:$24 sps:$4 sm:$0xff]   ;;  %v1396_v12 = vld [vmem:[#allocation8 + $0x68] ss:$24 sps:$4 sm:$0xff]  }
  0x47   :  { %339 = vmatprep.subr.bf16.mxu1 %v1387_v6  ;;  %v1397_v13 = vld [vmem:[#allocation8 + $0x94] ss:$24 sps:$4 sm:$0xff]   ;;  %v1401_v15 = vld [vmem:[#allocation8 + $0x90] ss:$24 sps:$4 sm:$0xff]   ;;  %v1403_v17 = vld [vmem:[#allocation8 + $0xc4] ss:$24 sps:$4 sm:$0xff]  }
  0x48   :  { %v1399_v14 = vld [vmem:[#allocation8 + $0x9c] ss:$24 sps:$4 sm:$0xff]   ;;  %v1402_v16 = vld [vmem:[#allocation8 + $0x98] ss:$24 sps:$4 sm:$0xff]   ;;  %v1405_v18 = vld [vmem:[#allocation8 + $0xcc] ss:$24 sps:$4 sm:$0xff]  }
  0x49   :  { %299 = vmatpush1.bf16.msra.mxu0 %v1389_v7  ;;  %v1407_v19 = vld [vmem:[#allocation8 + $0xc0] ss:$24 sps:$4 sm:$0xff]   ;;  %v1409_v21 = vld [vmem:[#allocation8 + $0xf4] ss:$24 sps:$4 sm:$0xff]   ;;  %v1413_v23 = vld [vmem:[#allocation8 + $0xf0] ss:$24 sps:$4 sm:$0xff]  }
  0x4a   :  { %340 = vmatpush1.bf16.msra.mxu1 %v1390_v8  ;;  %300 = vmatprep.subr.bf16.mxu0 %v1391_v9  ;;  %v1408_v20 = vld [vmem:[#allocation8 + $0xc8] ss:$24 sps:$4 sm:$0xff]   ;;  %v1411_v22 = vld [vmem:[#allocation8 + $0xfc] ss:$24 sps:$4 sm:$0xff]   ;;  %v1414_v24 = vld [vmem:[#allocation8 + $0xf8] ss:$24 sps:$4 sm:$0xff]  }
  0x4b   :  { %341 = vmatprep.subr.bf16.mxu1 %v1393_v10  ;;  %v1415_v25 = vld [vmem:[#allocation8 + $0x124] ss:$24 sps:$4 sm:$0xff]   ;;  %v1419_v27 = vld [vmem:[#allocation8 + $0x120] ss:$24 sps:$4 sm:$0xff]   ;;  %v1421_v29 = vld [vmem:[#allocation8 + $0x154] ss:$24 sps:$4 sm:$0xff]  }
  0x4c   :  { %v1417_v26 = vld [vmem:[#allocation8 + $0x12c] ss:$24 sps:$4 sm:$0xff]   ;;  %v1420_v28 = vld [vmem:[#allocation8 + $0x128] ss:$24 sps:$4 sm:$0xff]   ;;  %v1423_v30 = vld [vmem:[#allocation8 + $0x15c] ss:$24 sps:$4 sm:$0xff]  }
  0x4d   :  { %301 = vmatpush1.bf16.msra.mxu0 %v1395_v11  ;;  %v1425_v31 = vld [vmem:[#allocation8 + $0x150] ss:$24 sps:$4 sm:$0xff]   ;;  %v102_v33 = vld [vmem:[#allocation5] sm:$0xff]  ;;  %s1593_s3 = smov [#allocation3]  }
  0x4e   :  { %342 = vmatpush1.bf16.msra.mxu1 %v1396_v12  ;;  %302 = vmatprep.subr.bf16.mxu0 %v1397_v13  ;;  %v1426_v32 = vld [vmem:[#allocation8 + $0x158] ss:$24 sps:$4 sm:$0xff]   ;;  %v135_v34 = vpack.c.bf16 %v102_v33, %v102_v33  ;;  %s98_s1 = sshll.u32 %s1593_s3, 4  ;;  %s99_s1 = int_to_ptr.vmem [resolvable:$true] %s98_s1 }
  0x4f   :  { %343 = vmatprep.subr.bf16.mxu1 %v1399_v14 }
  0x51   :  { %303 = vmatpush1.bf16.msra.mxu0 %v1401_v15 }
  0x52   :  { %344 = vmatpush1.bf16.msra.mxu1 %v1402_v16  ;;  %304 = vmatprep.subr.bf16.mxu0 %v1403_v17 }
  0x53   :  { %345 = vmatprep.subr.bf16.mxu1 %v1405_v18 }
  0x55   :  { %305 = vmatpush1.bf16.msra.mxu0 %v1407_v19 }
  0x56   :  { %346 = vmatpush1.bf16.msra.mxu1 %v1408_v20  ;;  %306 = vmatprep.subr.bf16.mxu0 %v1409_v21 }
  0x57   :  { %347 = vmatprep.subr.bf16.mxu1 %v1411_v22 }
  0x59   :  { %307 = vmatpush1.bf16.msra.mxu0 %v1413_v23 }
  0x5a   :  { %348 = vmatpush1.bf16.msra.mxu1 %v1414_v24  ;;  %308 = vmatprep.subr.bf16.mxu0 %v1415_v25 }
  0x5b   :  { %349 = vmatprep.subr.bf16.mxu1 %v1417_v26 }
  0x5d   :  { %309 = vmatpush1.bf16.msra.mxu0 %v1419_v27 }
  0x5e   :  { %350 = vmatpush1.bf16.msra.mxu1 %v1420_v28  ;;  %310 = vmatprep.subr.bf16.mxu0 %v1421_v29 }
  0x5f   :  { %351 = vmatprep.subr.bf16.mxu1 %v1423_v30 }
  0x61   :  { %311 = vmatpush1.bf16.msra.mxu0 %v1425_v31 }
  0x62   :  { %352 = vmatpush1.bf16.msra.mxu1 %v1426_v32 }
  0x64   :  { %329 = vmatmul.mubr.bf16.vlgmr.msra.gmra.mrb[0].mxu0 %v135_v34 }
  0x65   :  { %370 = vmatmul.mubr.bf16.vlgmr.msra.gmra.mrb[0].mxu1 %v135_v34 }
  0x66   :  { %1534 = shalt.err (!%p1531_p12)  }
  0x67   :  { %s1535_s25 = scalar_lea.vmem %s99_s1, 2048  ;;  %p1540_p0 = scmp.lt.s32.totalorder %s99_s1, %s99_s1 }
  0x68   :  { %p1536_p13 = scmp.ne.s32.totalorder %s99_s1, %s1535_s25  ;;  %p1541_p1 = scmp.lt.s32.totalorder %s1535_s25, %s1535_s25 }
  0x6a   :  { %p1542_p2 = por %p1541_p1, %p1540_p0 }
  0x6c   :  { %p1543_p3 = pnand %p1542_p2, %p1536_p13 }
  0x6e   :  { %1546 = shalt.err (!%p1543_p3)  }
  0x6f   :  { %101 = dma.hbm_to_vmem [thread:$0]  %s1789_s4, 2048, %s99_s1, [#allocation4 + $0x1] }
 0x137   :  { %v1679_v35 = vpop.f32.mrb[0].mxu0 }
 0x138   :  { %v1681_v36 = vpop.f32.mrb[0].mxu1  ;;  %v380_v37 = vrot.slane %v1679_v35, 4  ;;  %v404_v38 = vmul.f32 %v1679_v35, %v1679_v35  ;;  %v1689_v41 = vpop.f32.mrb[1].mxu0 }
 0x139   :  { %v392_v39 = vrot.slane %v1681_v36, 4  ;;  %v406_v40 = vmul.f32 %v1681_v36, %v1681_v36  ;;  %v1691_v42 = vpop.f32.mrb[1].mxu1  ;;  %v386_v43 = vrot.slane %v1689_v41, 4  ;;  %v405_v44 = vmul.f32 %v1689_v41, %v1689_v41  ;;  %v334_v47 = vpop.f32.mrb[2].mxu0 }
 0x13a   :  { %v398_v45 = vrot.slane %v1691_v42, 4  ;;  %v407_v46 = vmul.f32 %v1691_v42, %v1691_v42  ;;  %v375_v48 = vpop.f32.mrb[2].mxu1  ;;  %v381_v49 = vadd.f32 %v380_v37, %v1679_v35  ;;  %v408_v50 = vrot.slane %v404_v38, 4  ;;  %v335_v53 = vpop.f32.mrb[3].mxu0 }
 0x13b   :  { %v393_v51 = vadd.f32 %v392_v39, %v1681_v36  ;;  %v420_v52 = vrot.slane %v406_v40, 4  ;;  %v376_v54 = vpop.f32.mrb[3].mxu1  ;;  %v387_v55 = vadd.f32 %v386_v43, %v1689_v41  ;;  %v414_v56 = vrot.slane %v405_v44, 4 }
 0x13c   :  { %v399_v57 = vadd.f32 %v398_v45, %v1691_v42  ;;  %v426_v58 = vrot.slane %v407_v46, 4  ;;  %v382_v59 = vrot.slane %v381_v49, 2  ;;  %v409_v60 = vadd.f32 %v408_v50, %v404_v38 }
 0x13d   :  { %v394_v61 = vrot.slane %v393_v51, 2  ;;  %v421_v62 = vadd.f32 %v420_v52, %v406_v40  ;;  %v388_v63 = vrot.slane %v387_v55, 2  ;;  %v415_v0 = vadd.f32 %v414_v56, %v405_v44 }
 0x13e   :  { %v400_v1 = vrot.slane %v399_v57, 2  ;;  %v427_v2 = vadd.f32 %v426_v58, %v407_v46  ;;  %v383_v3 = vadd.f32 %v382_v59, %v381_v49  ;;  %v410_v4 = vrot.slane %v409_v60, 2 }
 0x13f   :  { %v395_v5 = vadd.f32 %v394_v61, %v393_v51  ;;  %v422_v6 = vrot.slane %v421_v62, 2  ;;  %v389_v7 = vadd.f32 %v388_v63, %v387_v55  ;;  %v416_v8 = vrot.slane %v415_v0, 2 }
 0x140   :  { %v401_v9 = vadd.f32 %v400_v1, %v399_v57  ;;  %v428_v10 = vrot.slane %v427_v2, 2  ;;  %v384_v11 = vrot.slane %v383_v3, 1  ;;  %v411_v12 = vadd.f32 %v410_v4, %v409_v60 }
 0x141   :  { %v396_v13 = vrot.slane %v395_v5, 1  ;;  %v423_v14 = vadd.f32 %v422_v6, %v421_v62  ;;  %v390_v15 = vrot.slane %v389_v7, 1  ;;  %v417_v16 = vadd.f32 %v416_v8, %v415_v0  ;;  %v378_v6 = vld [vmem:[#allocation10] sm:$0xf] }
 0x142   :  { %v402_v17 = vrot.slane %v401_v9, 1  ;;  %v429_v18 = vadd.f32 %v428_v10, %v427_v2  ;;  %v385_v19 = vadd.f32 %v384_v11, %v383_v3  ;;  %v412_v20 = vrot.slane %v411_v12, 1 }
 0x143   :  { %v397_v21 = vadd.f32 %v396_v13, %v395_v5  ;;  %v424_v22 = vrot.slane %v423_v14, 1  ;;  %v391_v23 = vadd.f32 %v390_v15, %v389_v7  ;;  %v418_v24 = vrot.slane %v417_v16, 1 }
 0x144   :  { %v403_v25 = vadd.f32 %v402_v17, %v401_v9  ;;  %v430_v26 = vrot.slane %v429_v18, 1  ;;  %v413_v27 = vadd.f32 %v412_v20, %v411_v12  ;;  %v432_v28 = vmul.f32 0.125, %v385_v19 }
 0x145   :  { %v425_v29 = vadd.f32 %v424_v22, %v423_v14  ;;  %v434_v30 = vmul.f32 0.125, %v397_v21  ;;  %v419_v31 = vadd.f32 %v418_v24, %v417_v16  ;;  %v433_v32 = vmul.f32 0.125, %v391_v23 }
 0x146   :  { %v431_v33 = vadd.f32 %v430_v26, %v429_v18  ;;  %v435_v34 = vmul.f32 0.125, %v403_v25  ;;  %v436_v37 = vmul.f32 0.125, %v413_v27  ;;  %v440_v38 = vmul.f32 %v432_v28, %v432_v28 }
 0x147   :  { %v438_v39 = vmul.f32 0.125, %v425_v29  ;;  %v442_v40 = vmul.f32 %v434_v30, %v434_v30  ;;  %v437_v43 = vmul.f32 0.125, %v419_v31  ;;  %v441_v44 = vmul.f32 %v433_v32, %v433_v32 }
 0x148   :  { %v439_v45 = vmul.f32 0.125, %v431_v33  ;;  %v443_v46 = vmul.f32 %v435_v34, %v435_v34  ;;  %v444_v47 = vsub.f32 %v436_v37, %v440_v38  ;;  %v1594_v55 = vmov 1966171168   ;;  %v379_v33 = vld [vmem:[#allocation10 + $0x4] sm:$0xf] }
 0x149   :  { %v446_v48 = vsub.f32 %v438_v39, %v442_v40  ;;  %v445_v49 = vsub.f32 %v437_v43, %v441_v44  ;;  %v463_v56 = vunpack.c.l.s4 %v1594_v55  ;;  %v465_v57 = vlaneseq }
 0x14a   :  { %v447_v50 = vsub.f32 %v439_v45, %v443_v46  ;;  %v448_v51 = vadd.f32 1e-05, %v444_v47 }
 0x14b   :  { %v450_v52 = vadd.f32 1e-05, %v446_v48  ;;  %v449_v53 = vadd.f32 1e-05, %v445_v49  ;;  %v464_v58 = vunpack.c.0.s8 %v463_v56  ;;  %v466_v59 = vshrl.u32 %v465_v57, 7 }
 0x14c   :  { %v451_v54 = vadd.f32 1e-05, %v447_v50  ;;  %1427 = vrsqrt.f32 %v448_v51 }
 0x14d   :  { %1429 = vrsqrt.f32 %v450_v52  ;;  %v1703_v62 = vsub.s32 %v464_v58, %v466_v59  ;;  %v1707_v7 = vsub.s32 0, %v466_v59  ;;  %v1710_v9 = vsub.s32 1, %v466_v59 }
 0x14e   :  { %1431 = vrsqrt.f32 %v449_v53  ;;  %v497_v10 = vsub.s32 2, %v466_v59  ;;  %v501_v11 = vsub.s32 3, %v466_v59 }
 0x14f   :  { %1433 = vrsqrt.f32 %v451_v54 }
 0x156   :  { %v1428_v60 = vpop.eup %1427 }
 0x157   :  { %v1430_v61 = vpop.eup %1429 }
 0x158   :  { %v1432_v63 = vpop.eup %1431 }
 0x159   :  { %v1434_v0 = vpop.eup %1433  ;;  %v460_v1 = vcombine.low %v1428_v60, %v1432_v63 }
 0x15a   :  { %v461_v2 = vcombine.low %v1430_v61, %v1434_v0 }
 0x15b   :  { %v468_v3 = vrot.slane %v460_v1, %v1703_v62 }
 0x15c   :  { %v475_v4 = vrot.slane %v461_v2, %v1703_v62 }
 0x15e   :  { %v476_v5 = vcombine.low %v468_v3, %v475_v4 }
 0x160   :  { %v483_v8 = vrot.slane %v476_v5, %v1703_v62 }
 0x162   :  { %v485_v12 = vmul.f32 %v483_v8, %v378_v6 }
 0x164   :  { %v490_v13 = vrot.slane %v485_v12, %v1707_v7  ;;  %v494_v14 = vrot.slane %v485_v12, %v1710_v9  ;;  %v498_v15 = vrot.slane %v485_v12, %v497_v10  ;;  %v502_v16 = vrot.slane %v485_v12, %v501_v11 }
 0x166   :  { %v507_v17 = vmul.f32 %v490_v13, %v432_v28  ;;  %v508_v18 = vmul.f32 %v494_v14, %v433_v32  ;;  %v509_v19 = vmul.f32 %v498_v15, %v434_v30  ;;  %v510_v20 = vmul.f32 %v502_v16, %v435_v34 }
 0x167   :  { %v541_v21 = vmul.f32 %v490_v13, %v1679_v35  ;;  %v542_v22 = vmul.f32 %v494_v14, %v1689_v41  ;;  %v543_v23 = vmul.f32 %v498_v15, %v1681_v36  ;;  %v544_v24 = vmul.f32 %v502_v16, %v1691_v42 }
 0x168   :  { %v515_v25 = vcombine.low %v507_v17, %v508_v18  ;;  %v516_v26 = vcombine.low %v509_v19, %v510_v20 }
 0x16a   :  { %v523_v27 = vrot.slane %v515_v25, %v1703_v62  ;;  %v530_v29 = vrot.slane %v516_v26, %v1703_v62 }
 0x16c   :  { %v531_v31 = vcombine.low %v523_v27, %v530_v29 }
 0x16e   :  { %v538_v28 = vrot.slane %v531_v31, %v1703_v62 }
 0x170   :  { %v540_v30 = vsub.f32 %v379_v33, %v538_v28 }
 0x172   :  { %v549_v32 = vrot.slane %v540_v30, %v1707_v7  ;;  %v553_v35 = vrot.slane %v540_v30, %v1710_v9  ;;  %v557_v41 = vrot.slane %v540_v30, %v497_v10  ;;  %v561_v34 = vrot.slane %v540_v30, %v501_v11 }
 0x174   :  { %v1723_v36 = vadd.f32 %v549_v32, %v541_v21  ;;  %v567_v42 = vadd.f32 %v553_v35, %v542_v22  ;;  %v1725_v37 = vadd.f32 %v557_v41, %v543_v23  ;;  %v1727_v38 = vadd.f32 %v561_v34, %v544_v24 }
 0x176   :  { %v570_v39 = vmax.f32 %v1723_v36, 0.0  ;;  %v571_v40 = vmax.f32 %v567_v42, 0.0  ;;  %v572_v43 = vmax.f32 %v1725_v37, 0.0  ;;  %v573_v44 = vmax.f32 %v1727_v38, 0.0 }
 0x177   :  { %1573 = dma.done.wait [#allocation4], 8192 }
 0x178   :  { %1574 = vsyncadd [#allocation4], 4294959104  ;;  %v643_v45 = vpack.c.bf16 %v571_v40, %v571_v40  ;;  %v579_v46 = vld [vmem:[#allocation2 + $0x8] sm:$0xff]  ;;  %v578_v47 = vld [vmem:[#allocation2] sm:$0xff]  ;;  %v642_v18 = vpack.c.bf16 %v570_v39, %v570_v39  ;;  %v645_v19 = vpack.c.bf16 %v573_v44, %v573_v44 }
 0x179   :  { %v581_v48 = vld [vmem:[#allocation2 + $0x18] sm:$0xff]  ;;  %646 = vmatprep.subr.bf16.mxu0 %v579_v46  ;;  %v580_v49 = vld [vmem:[#allocation2 + $0x10] sm:$0xff]  ;;  %v583_v50 = vld [vmem:[#allocation2 + $0x28] sm:$0xff] }
 0x17a   :  { %678 = vmatprep.mubr.bf16.mxu0 %v643_v45  ;;  %647 = vmatpush1.bf16.msra.mxu0 %v578_v47  ;;  %v582_v51 = vld [vmem:[#allocation2 + $0x20] sm:$0xff]  ;;  %v585_v52 = vld [vmem:[#allocation2 + $0x38] sm:$0xff]  ;;  %v584_v53 = vld [vmem:[#allocation2 + $0x30] sm:$0xff] }
 0x17b   :  { %648 = vmatprep.subr.bf16.mxu0 %v581_v48  ;;  %v587_v54 = vld [vmem:[#allocation2 + $0x48] sm:$0xff]  ;;  %v586_v55 = vld [vmem:[#allocation2 + $0x40] sm:$0xff]  ;;  %v589_v56 = vld [vmem:[#allocation2 + $0x58] sm:$0xff] }
 0x17c   :  { %v588_v57 = vld [vmem:[#allocation2 + $0x50] sm:$0xff]  ;;  %v591_v58 = vld [vmem:[#allocation2 + $0x68] sm:$0xff]  ;;  %v590_v59 = vld [vmem:[#allocation2 + $0x60] sm:$0xff] }
 0x17d   :  { %v593_v60 = vld [vmem:[#allocation2 + $0x78] sm:$0xff]  ;;  %v592_v61 = vld [vmem:[#allocation2 + $0x70] sm:$0xff]  ;;  %v595_v63 = vld [vmem:[#allocation2 + $0x88] sm:$0xff] }
 0x17e   :  { %649 = vmatpush1.bf16.msra.mxu0 %v580_v49  ;;  %v594_v0 = vld [vmem:[#allocation2 + $0x80] sm:$0xff]  ;;  %v597_v1 = vld [vmem:[#allocation2 + $0x98] sm:$0xff]  ;;  %v596_v2 = vld [vmem:[#allocation2 + $0x90] sm:$0xff] }
 0x17f   :  { %650 = vmatprep.subr.bf16.mxu0 %v583_v50  ;;  %v599_v3 = vld [vmem:[#allocation2 + $0xa8] sm:$0xff]  ;;  %v598_v4 = vld [vmem:[#allocation2 + $0xa0] sm:$0xff]  ;;  %v601_v5 = vld [vmem:[#allocation2 + $0xb8] sm:$0xff] }
 0x180   :  { %v600_v6 = vld [vmem:[#allocation2 + $0xb0] sm:$0xff]  ;;  %v603_v8 = vld [vmem:[#allocation2 + $0xc8] sm:$0xff]  ;;  %v602_v10 = vld [vmem:[#allocation2 + $0xc0] sm:$0xff] }
 0x181   :  { %v605_v11 = vld [vmem:[#allocation2 + $0xd8] sm:$0xff]  ;;  %v604_v12 = vld [vmem:[#allocation2 + $0xd0] sm:$0xff]  ;;  %v607_v13 = vld [vmem:[#allocation2 + $0xe8] sm:$0xff] }
 0x182   :  { %651 = vmatpush1.bf16.msra.mxu0 %v582_v51  ;;  %v606_v14 = vld [vmem:[#allocation2 + $0xe0] sm:$0xff]  ;;  %v609_v15 = vld [vmem:[#allocation2 + $0xf8] sm:$0xff]  ;;  %v608_v16 = vld [vmem:[#allocation2 + $0xf0] sm:$0xff] }
 0x183   :  { %652 = vmatprep.subr.bf16.mxu0 %v585_v52  ;;  %v611_v17 = vld [vmem:[#allocation2 + $0x108] sm:$0xff]  ;;  %v610_v20 = vld [vmem:[#allocation2 + $0x100] sm:$0xff]  ;;  %v613_v21 = vld [vmem:[#allocation2 + $0x118] sm:$0xff] }
 0x184   :  { %v612_v22 = vld [vmem:[#allocation2 + $0x110] sm:$0xff]  ;;  %v615_v23 = vld [vmem:[#allocation2 + $0x128] sm:$0xff]  ;;  %v614_v24 = vld [vmem:[#allocation2 + $0x120] sm:$0xff] }
 0x185   :  { %v617_v25 = vld [vmem:[#allocation2 + $0x138] sm:$0xff]  ;;  %v616_v26 = vld [vmem:[#allocation2 + $0x130] sm:$0xff]  ;;  %v619_v27 = vld [vmem:[#allocation2 + $0x148] sm:$0xff] }
 0x186   :  { %653 = vmatpush1.bf16.msra.mxu0 %v584_v53  ;;  %v618_v29 = vld [vmem:[#allocation2 + $0x140] sm:$0xff]  ;;  %v621_v31 = vld [vmem:[#allocation2 + $0x158] sm:$0xff]  ;;  %v620_v33 = vld [vmem:[#allocation2 + $0x150] sm:$0xff]  ;;  %v644_v53 = vpack.c.bf16 %v572_v43, %v572_v43 }
 0x187   :  { %654 = vmatprep.subr.bf16.mxu0 %v587_v54  ;;  %v623_v28 = vld [vmem:[#allocation2 + $0x168] sm:$0xff]  ;;  %v622_v30 = vld [vmem:[#allocation2 + $0x160] sm:$0xff]  ;;  %v625_v32 = vld [vmem:[#allocation2 + $0x178] sm:$0xff] }
 0x188   :  { %v624_v35 = vld [vmem:[#allocation2 + $0x170] sm:$0xff]  ;;  %v627_v41 = vld [vmem:[#allocation2 + $0x188] sm:$0xff]  ;;  %v626_v34 = vld [vmem:[#allocation2 + $0x180] sm:$0xff] }
 0x189   :  { %v629_v36 = vld [vmem:[#allocation2 + $0x198] sm:$0xff]  ;;  %v628_v42 = vld [vmem:[#allocation2 + $0x190] sm:$0xff]  ;;  %v631_v38 = vld [vmem:[#allocation2 + $0x1a8] sm:$0xff] }
 0x18a   :  { %655 = vmatpush1.bf16.msra.mxu0 %v586_v55  ;;  %v630_v39 = vld [vmem:[#allocation2 + $0x1a0] sm:$0xff]  ;;  %v633_v40 = vld [vmem:[#allocation2 + $0x1b8] sm:$0xff]  ;;  %v632_v44 = vld [vmem:[#allocation2 + $0x1b0] sm:$0xff] }
 0x18b   :  { %656 = vmatprep.subr.bf16.mxu0 %v589_v56  ;;  %v635_v45 = vld [vmem:[#allocation2 + $0x1c8] sm:$0xff]  ;;  %v634_v46 = vld [vmem:[#allocation2 + $0x1c0] sm:$0xff]  ;;  %v637_v47 = vld [vmem:[#allocation2 + $0x1d8] sm:$0xff] }
 0x18c   :  { %v636_v48 = vld [vmem:[#allocation2 + $0x1d0] sm:$0xff]  ;;  %v639_v49 = vld [vmem:[#allocation2 + $0x1e8] sm:$0xff]  ;;  %v638_v50 = vld [vmem:[#allocation2 + $0x1e0] sm:$0xff] }
 0x18d   :  { %v641_v51 = vld [vmem:[#allocation2 + $0x1f8] sm:$0xff]  ;;  %v640_v52 = vld [vmem:[#allocation2 + $0x1f0] sm:$0xff] }
 0x18e   :  { %657 = vmatpush1.bf16.msra.mxu0 %v588_v57 }
 0x18f   :  { %658 = vmatprep.subr.bf16.mxu0 %v591_v58 }
 0x192   :  { %659 = vmatpush1.bf16.msra.mxu0 %v590_v59 }
 0x193   :  { %660 = vmatprep.subr.bf16.mxu0 %v593_v60 }
 0x196   :  { %661 = vmatpush1.bf16.msra.mxu0 %v592_v61 }
 0x197   :  { %662 = vmatprep.subr.bf16.mxu0 %v595_v63 }
 0x19a   :  { %663 = vmatpush1.bf16.msra.mxu0 %v594_v0 }
 0x19b   :  { %664 = vmatprep.subr.bf16.mxu0 %v597_v1 }
 0x19e   :  { %665 = vmatpush1.bf16.msra.mxu0 %v596_v2 }
 0x19f   :  { %666 = vmatprep.subr.bf16.mxu0 %v599_v3 }
 0x1a2   :  { %667 = vmatpush1.bf16.msra.mxu0 %v598_v4 }
 0x1a3   :  { %668 = vmatprep.subr.bf16.mxu0 %v601_v5 }
 0x1a6   :  { %669 = vmatpush1.bf16.msra.mxu0 %v600_v6 }
 0x1a7   :  { %670 = vmatprep.subr.bf16.mxu0 %v603_v8 }
 0x1aa   :  { %671 = vmatpush1.bf16.msra.mxu0 %v602_v10 }
 0x1ab   :  { %672 = vmatprep.subr.bf16.mxu0 %v605_v11 }
 0x1ae   :  { %673 = vmatpush1.bf16.msra.mxu0 %v604_v12 }
 0x1af   :  { %674 = vmatprep.subr.bf16.mxu0 %v607_v13 }
 0x1b2   :  { %675 = vmatpush1.bf16.msra.mxu0 %v606_v14 }
 0x1b3   :  { %676 = vmatprep.subr.bf16.mxu0 %v609_v15 }
 0x1b6   :  { %677 = vmatpush1.bf16.msra.mxu0 %v608_v16 }
 0x1b7   :  { %687 = vmatprep.subr.bf16.mxu0 %v611_v17 }
 0x1b9   :  { %679 = vmatmul.mubr.bf16.vlgmr.msra.gmra.mrb[4].mxu0 %v642_v18 }
 0x1ba   :  { %688 = vmatpush1.bf16.msra.mxu0 %v610_v20  ;;  %719 = vmatprep.mubr.bf16.mxu0 %v645_v19 }
 0x1bb   :  { %689 = vmatprep.subr.bf16.mxu0 %v613_v21 }
 0x1be   :  { %690 = vmatpush1.bf16.msra.mxu0 %v612_v22 }
 0x1bf   :  { %691 = vmatprep.subr.bf16.mxu0 %v615_v23 }
 0x1c2   :  { %692 = vmatpush1.bf16.msra.mxu0 %v614_v24 }
 0x1c3   :  { %693 = vmatprep.subr.bf16.mxu0 %v617_v25 }
 0x1c6   :  { %694 = vmatpush1.bf16.msra.mxu0 %v616_v26 }
 0x1c7   :  { %695 = vmatprep.subr.bf16.mxu0 %v619_v27 }
 0x1ca   :  { %696 = vmatpush1.bf16.msra.mxu0 %v618_v29 }
 0x1cb   :  { %697 = vmatprep.subr.bf16.mxu0 %v621_v31 }
 0x1ce   :  { %698 = vmatpush1.bf16.msra.mxu0 %v620_v33 }
 0x1cf   :  { %699 = vmatprep.subr.bf16.mxu0 %v623_v28 }
 0x1d2   :  { %700 = vmatpush1.bf16.msra.mxu0 %v622_v30 }
 0x1d3   :  { %701 = vmatprep.subr.bf16.mxu0 %v625_v32 }
 0x1d6   :  { %702 = vmatpush1.bf16.msra.mxu0 %v624_v35 }
 0x1d7   :  { %703 = vmatprep.subr.bf16.mxu0 %v627_v41  ;;  %v728_v41 = vld [vmem:[#allocation10 + $0x8] sm:$0x3] }
 0x1da   :  { %704 = vmatpush1.bf16.msra.mxu0 %v626_v34 }
 0x1db   :  { %705 = vmatprep.subr.bf16.mxu0 %v629_v36 }
 0x1de   :  { %706 = vmatpush1.bf16.msra.mxu0 %v628_v42 }
 0x1df   :  { %707 = vmatprep.subr.bf16.mxu0 %v631_v38 }
 0x1e2   :  { %708 = vmatpush1.bf16.msra.mxu0 %v630_v39 }
 0x1e3   :  { %709 = vmatprep.subr.bf16.mxu0 %v633_v40 }
 0x1e6   :  { %710 = vmatpush1.bf16.msra.mxu0 %v632_v44 }
 0x1e7   :  { %711 = vmatprep.subr.bf16.mxu0 %v635_v45 }
 0x1ea   :  { %712 = vmatpush1.bf16.msra.mxu0 %v634_v46 }
 0x1eb   :  { %713 = vmatprep.subr.bf16.mxu0 %v637_v47 }
 0x1ee   :  { %714 = vmatpush1.bf16.msra.mxu0 %v636_v48  ;;  %v729_v48 = vld [vmem:[#allocation10 + $0xa] sm:$0x3] }
 0x1ef   :  { %715 = vmatprep.subr.bf16.mxu0 %v639_v49 }
 0x1f2   :  { %716 = vmatpush1.bf16.msra.mxu0 %v638_v50 }
 0x1f3   :  { %717 = vmatprep.subr.bf16.mxu0 %v641_v51 }
 0x1f6   :  { %718 = vmatpush1.bf16.msra.mxu0 %v640_v52 }
 0x1f9   :  { %720 = vmatmul.mubr.bf16.vlgmr.msra.gmra.mrb[4].mxu0 %v644_v53 }
 0x2cc   :  { %v721_v54 = vpop.f32.mrb[4].mxu0 }
 0x2cd   :  { %v730_v55 = vrot.slane %v721_v54, 4  ;;  %v742_v56 = vmul.f32 %v721_v54, %v721_v54  ;;  %v723_v57 = vpop.f32.mrb[5].mxu0 }
 0x2ce   :  { %v736_v58 = vrot.slane %v723_v57, 4  ;;  %v743_v59 = vmul.f32 %v723_v57, %v723_v57  ;;  %v725_v60 = vpop.f32.mrb[6].mxu0 }
 0x2cf   :  { %v731_v61 = vadd.f32 %v730_v55, %v721_v54  ;;  %v744_v63 = vrot.slane %v742_v56, 4  ;;  %v726_v0 = vpop.f32.mrb[7].mxu0 }
 0x2d0   :  { %v737_v1 = vadd.f32 %v736_v58, %v723_v57  ;;  %v750_v2 = vrot.slane %v743_v59, 4 }
 0x2d1   :  { %v732_v3 = vrot.slane %v731_v61, 2  ;;  %v745_v4 = vadd.f32 %v744_v63, %v742_v56 }
 0x2d2   :  { %v738_v5 = vrot.slane %v737_v1, 2  ;;  %v751_v37 = vadd.f32 %v750_v2, %v743_v59 }
 0x2d3   :  { %v733_v6 = vadd.f32 %v732_v3, %v731_v61  ;;  %v746_v43 = vrot.slane %v745_v4, 2 }
 0x2d4   :  { %v739_v8 = vadd.f32 %v738_v5, %v737_v1  ;;  %v752_v10 = vrot.slane %v751_v37, 2 }
 0x2d5   :  { %v734_v11 = vrot.slane %v733_v6, 1  ;;  %v747_v12 = vadd.f32 %v746_v43, %v745_v4 }
 0x2d6   :  { %v740_v13 = vrot.slane %v739_v8, 1  ;;  %v753_v14 = vadd.f32 %v752_v10, %v751_v37 }
 0x2d7   :  { %v735_v15 = vadd.f32 %v734_v11, %v733_v6  ;;  %v748_v16 = vrot.slane %v747_v12, 1 }
 0x2d8   :  { %v741_v17 = vadd.f32 %v740_v13, %v739_v8  ;;  %v754_v18 = vrot.slane %v753_v14, 1 }
 0x2d9   :  { %v749_v19 = vadd.f32 %v748_v16, %v747_v12  ;;  %v756_v20 = vmul.f32 0.125, %v735_v15 }
 0x2da   :  { %v755_v21 = vadd.f32 %v754_v18, %v753_v14  ;;  %v757_v22 = vmul.f32 0.125, %v741_v17 }
 0x2db   :  { %v758_v23 = vmul.f32 0.125, %v749_v19  ;;  %v760_v24 = vmul.f32 %v756_v20, %v756_v20 }
 0x2dc   :  { %v759_v25 = vmul.f32 0.125, %v755_v21  ;;  %v761_v26 = vmul.f32 %v757_v22, %v757_v22 }
 0x2dd   :  { %v762_v27 = vsub.f32 %v758_v23, %v760_v24 }
 0x2de   :  { %v763_v29 = vsub.f32 %v759_v25, %v761_v26 }
 0x2df   :  { %v764_v31 = vadd.f32 1e-05, %v762_v27 }
 0x2e0   :  { %v765_v33 = vadd.f32 1e-05, %v763_v29 }
 0x2e1   :  { %1435 = vrsqrt.f32 %v764_v31 }
 0x2e2   :  { %1437 = vrsqrt.f32 %v765_v33 }
 0x2eb   :  { %v1436_v28 = vpop.eup %1435 }
 0x2ec   :  { %v1438_v30 = vpop.eup %1437 }
 0x2ed   :  { %v770_v32 = vcombine.low %v1436_v28, %v1438_v30 }
 0x2ef   :  { %v777_v35 = vrot.slane %v770_v32, %v1703_v62 }
 0x2f1   :  { %v784_v34 = vrot.slane %v777_v35, %v1703_v62 }
 0x2f3   :  { %v786_v36 = vmul.f32 %v784_v34, %v728_v41 }
 0x2f5   :  { %v791_v42 = vrot.slane %v786_v36, %v1707_v7  ;;  %v795_v38 = vrot.slane %v786_v36, %v1710_v9 }
 0x2f7   :  { %v798_v39 = vmul.f32 %v791_v42, %v756_v20  ;;  %v799_v40 = vmul.f32 %v795_v38, %v757_v22  ;;  %v819_v44 = vmul.f32 %v791_v42, %v721_v54  ;;  %v820_v45 = vmul.f32 %v795_v38, %v723_v57 }
 0x2f9   :  { %v802_v46 = vcombine.low %v798_v39, %v799_v40 }
 0x2fb   :  { %v809_v47 = vrot.slane %v802_v46, %v1703_v62 }
 0x2fd   :  { %v816_v49 = vrot.slane %v809_v47, %v1703_v62 }
 0x2ff   :  { %v818_v50 = vsub.f32 %v729_v48, %v816_v49 }
 0x301   :  { %v825_v51 = vrot.slane %v818_v50, %v1707_v7  ;;  %v829_v52 = vrot.slane %v818_v50, %v1710_v9 }
 0x303   :  { %v832_v53 = vadd.f32 %v825_v51, %v819_v44  ;;  %v833_v55 = vadd.f32 %v829_v52, %v820_v45 }
 0x305   :  { %v834_v56 = vmax.f32 %v832_v53, 0.0  ;;  %v835_v58 = vmax.f32 %v833_v55, 0.0 }
 0x306   :  { %1575 = dma.done.wait [#allocation4 + $0x1], 2048 }
 0x307   :  { %1576 = vsyncadd [#allocation4 + $0x1], 4294965248  ;;  %v857_v59 = vpack.c.bf16 %v835_v58, %v835_v58  ;;  %v848_v54 = vld [vmem:[#allocation3 + $0x40] sm:$0xff]  ;;  %v849_v60 = vld [vmem:[#allocation3 + $0x48] sm:$0xff]  ;;  %v856_v8 = vpack.c.bf16 %v834_v56, %v834_v56  ;;  %v1595_v11 = vmov 0.0   ;;  %vm1596_vm0 = vmmov 0  }
 0x308   :  { %v840_v57 = vld [vmem:[#allocation3] sm:$0xff]  ;;  %1276 = vmatprep.subr.bf16.mxu1 %v848_v54  ;;  %v841_v62 = vld [vmem:[#allocation3 + $0x8] sm:$0xff]  ;;  %v850_v61 = vld [vmem:[#allocation3 + $0x50] sm:$0xff]  ;;  %s1597_s4 = smov [#allocation11]  }
 0x309   :  { %890 = vmatprep.mubr.bf16.mxu1 %v857_v59  ;;  %1277 = vmatpush3.bf16.msra.mxu1 %v840_v57  ;;  %v842_v63 = vld [vmem:[#allocation3 + $0x10] sm:$0xff]  ;;  %v851_v0 = vld [vmem:[#allocation3 + $0x58] sm:$0xff]  ;;  %v852_v1 = vld [vmem:[#allocation3 + $0x60] sm:$0xff]  ;;  %s1200_s28 = sshll.u32 %s1597_s4, 4  ;;  %s1201_s28 = int_to_ptr.vmem [resolvable:$true] %s1200_s28 }
 0x30a   :  { %1278 = vmatprep.subr.bf16.mxu1 %v849_v60  ;;  %v843_v9 = vld [vmem:[#allocation3 + $0x18] sm:$0xff]  ;;  %v844_v2 = vld [vmem:[#allocation3 + $0x20] sm:$0xff]  ;;  %v853_v3 = vld [vmem:[#allocation3 + $0x68] sm:$0xff]  ;;  %s1547_s0 = scalar_lea.vmem %s1201_s28, 128  ;;  %p1552_p5 = scmp.lt.s32.totalorder %s1201_s28, %s1201_s28 }
 0x30b   :  { %v845_v4 = vld [vmem:[#allocation3 + $0x28] sm:$0xff]  ;;  %v854_v5 = vld [vmem:[#allocation3 + $0x70] sm:$0xff]  ;;  %v855_v6 = vld [vmem:[#allocation3 + $0x78] sm:$0xff]  ;;  %p1548_p4 = scmp.ne.s32.totalorder %s1201_s28, %s1547_s0  ;;  %p1553_p6 = scmp.lt.s32.totalorder %s1547_s0, %s1547_s0 }
 0x30c   :  { %v846_v37 = vld [vmem:[#allocation3 + $0x30] sm:$0xff]  ;;  %v847_v43 = vld [vmem:[#allocation3 + $0x38] sm:$0xff]  ;;  %v1440_v12 = vld [vmem:[#allocation8 + $0x40] ss:$24 sps:$4 sm:$0xff]  }
 0x30d   :  { %1279 = vmatpush3.bf16.msra.mxu1 %v841_v62  ;;  %v1439_v10 = vld [vmem:[#allocation8 + $0x10] ss:$24 sps:$4 sm:$0xff]   ;;  %v1442_v14 = vld [vmem:[#allocation8 + $0xa0] ss:$24 sps:$4 sm:$0xff]   ;;  %v898_v44 = vld [vmem:[#allocation10 + $0xc] sm:$0x1]  ;;  %p1554_p7 = por %p1553_p6, %p1552_p5 }
 0x30e   :  { %1280 = vmatprep.subr.bf16.mxu1 %v850_v61  ;;  %v1441_v13 = vld [vmem:[#allocation8 + $0x70] ss:$24 sps:$4 sm:$0xff]   ;;  %v1444_v16 = vld [vmem:[#allocation8 + $0x100] ss:$24 sps:$4 sm:$0xff]   ;;  %v899_v47 = vld [vmem:[#allocation10 + $0xd] sm:$0x1] }
 0x30f   :  { %v1443_v15 = vld [vmem:[#allocation8 + $0xd0] ss:$24 sps:$4 sm:$0xff]   ;;  %v1446_v18 = vld [vmem:[#allocation8 + $0x160] ss:$24 sps:$4 sm:$0xff]   ;;  %v1447_v58 = vld [vmem:[#allocation8 + $0x14] ss:$24 sps:$4 sm:$0xff]   ;;  %p1555_p8 = pnand %p1554_p7, %p1548_p4 }
 0x310   :  { %v1445_v17 = vld [vmem:[#allocation8 + $0x130] ss:$24 sps:$4 sm:$0xff]   ;;  %v1448_v59 = vld [vmem:[#allocation8 + $0x44] ss:$24 sps:$4 sm:$0xff]   ;;  %v1449_v54 = vld [vmem:[#allocation8 + $0x74] ss:$24 sps:$4 sm:$0xff]  }
 0x311   :  { %1281 = vmatpush3.bf16.msra.mxu1 %v842_v63  ;;  %v1450_v57 = vld [vmem:[#allocation8 + $0xa4] ss:$24 sps:$4 sm:$0xff]   ;;  %v1451_v60 = vld [vmem:[#allocation8 + $0xd4] ss:$24 sps:$4 sm:$0xff]  }
 0x312   :  { %1282 = vmatprep.subr.bf16.mxu1 %v851_v0  ;;  %v1452_v62 = vld [vmem:[#allocation8 + $0x104] ss:$24 sps:$4 sm:$0xff]   ;;  %v1453_v61 = vld [vmem:[#allocation8 + $0x134] ss:$24 sps:$4 sm:$0xff]  }
 0x313   :  { %v1454_v63 = vld [vmem:[#allocation8 + $0x164] ss:$24 sps:$4 sm:$0xff]  }
 0x315   :  { %1283 = vmatpush3.bf16.msra.mxu1 %v843_v9 }
 0x316   :  { %1284 = vmatprep.subr.bf16.mxu1 %v852_v1 }
 0x319   :  { %1285 = vmatpush3.bf16.msra.mxu1 %v844_v2 }
 0x31a   :  { %1286 = vmatprep.subr.bf16.mxu1 %v853_v3 }
 0x31d   :  { %1287 = vmatpush3.bf16.msra.mxu1 %v845_v4 }
 0x31e   :  { %1288 = vmatprep.subr.bf16.mxu1 %v854_v5 }
 0x321   :  { %1289 = vmatpush3.bf16.msra.mxu1 %v846_v37 }
 0x322   :  { %1290 = vmatprep.subr.bf16.mxu1 %v855_v6 }
 0x325   :  { %1291 = vmatpush3.bf16.msra.mxu1 %v847_v43 }
 0x326   :  { %1316 = vmatprep.subr.bf16.mxu1 %v1595_v11 }
 0x328   :  { %891 = vmatmul.mubr.bf16.vlgmr.msra.gmra.mrb[4].mxu1 %v856_v8 }
 0x329   :  { %1317 = vmatpush3.bf16.msra.mxu1 %v1439_v10  ;;  %1332 = vmatprep.mubr.msk.bf16.mxu1 %vm1596_vm0, %v1595_v11 }
 0x32a   :  { %1318 = vmatprep.subr.bf16.mxu1 %v1595_v11 }
 0x32d   :  { %1319 = vmatpush3.bf16.msra.mxu1 %v1440_v12 }
 0x32e   :  { %1320 = vmatprep.subr.bf16.mxu1 %v1595_v11 }
 0x331   :  { %1321 = vmatpush3.bf16.msra.mxu1 %v1441_v13 }
 0x332   :  { %1322 = vmatprep.subr.bf16.mxu1 %v1595_v11 }
 0x335   :  { %1323 = vmatpush3.bf16.msra.mxu1 %v1442_v14 }
 0x336   :  { %1324 = vmatprep.subr.bf16.mxu1 %v1595_v11 }
 0x339   :  { %1325 = vmatpush3.bf16.msra.mxu1 %v1443_v15 }
 0x33a   :  { %1326 = vmatprep.subr.bf16.mxu1 %v1595_v11 }
 0x33d   :  { %1327 = vmatpush3.bf16.msra.mxu1 %v1444_v16 }
 0x33e   :  { %1328 = vmatprep.subr.bf16.mxu1 %v1595_v11 }
 0x341   :  { %1329 = vmatpush3.bf16.msra.mxu1 %v1445_v17 }
 0x342   :  { %1330 = vmatprep.subr.bf16.mxu1 %v1595_v11 }
 0x345   :  { %1331 = vmatpush3.bf16.msra.mxu1 %v1446_v18 }
 0x346   :  { %1336 = vmatprep.subr.bf16.mxu1 %v1595_v11 }
 0x3fb   :  { %v1292_v19 = vpop.f32.mrb[4].mxu1 }
 0x3fc   :  { %v1293_v20 = vpop.f32.mrb[5].mxu1 }
 0x3fd   :  { %v1294_v21 = vadd.f32 %v1293_v20, %v1292_v19  ;;  %v1295_v22 = vpop.f32.mrb[6].mxu1 }
 0x3fe   :  { %v1296_v23 = vpop.f32.mrb[7].mxu1 }
 0x3ff   :  { %v900_v24 = vrot.slane %v1294_v21, 4  ;;  %v906_v25 = vmul.f32 %v1294_v21, %v1294_v21 }
 0x401   :  { %v901_v26 = vadd.f32 %v1294_v21, %v900_v24  ;;  %v907_v27 = vrot.slane %v906_v25, 4  ;;  %v1043_v24 = vld [vmem:[#allocation10 + $0xf] sm:$0x1] }
 0x403   :  { %v902_v29 = vrot.slane %v901_v26, 2  ;;  %v908_v31 = vadd.f32 %v907_v27, %v906_v25 }
 0x405   :  { %v903_v33 = vadd.f32 %v902_v29, %v901_v26  ;;  %v909_v28 = vrot.slane %v908_v31, 2 }
 0x407   :  { %v904_v30 = vrot.slane %v903_v33, 1  ;;  %v910_v32 = vadd.f32 %v909_v28, %v908_v31 }
 0x409   :  { %v905_v35 = vadd.f32 %v904_v30, %v903_v33  ;;  %v911_v41 = vrot.slane %v910_v32, 1 }
 0x40b   :  { %v912_v34 = vadd.f32 %v911_v41, %v910_v32  ;;  %v913_v36 = vmul.f32 0.125, %v905_v35  ;;  %v1265_v32 = vld [vmem:[#allocation10 + $0x10] ss:$0 sm:$0xff] }
 0x40d   :  { %v914_v42 = vmul.f32 0.125, %v912_v34  ;;  %v915_v38 = vmul.f32 %v913_v36, %v913_v36 }
 0x40f   :  { %v916_v39 = vsub.f32 %v914_v42, %v915_v38 }
 0x411   :  { %v917_v40 = vadd.f32 1e-05, %v916_v39 }
 0x413   :  { %1455 = vrsqrt.f32 %v917_v40 }
 0x41d   :  { %v1456_v45 = vpop.eup %1455 }
 0x41e   :  { %v919_v46 = vmul.f32 %v1456_v45, %v898_v44 }
 0x420   :  { %v926_v48 = vrot.slane %v919_v46, %v1707_v7  ;;  %v920_v49 = vmul.f32 %v919_v46, %v913_v36 }
 0x422   :  { %v921_v50 = vsub.f32 %v899_v47, %v920_v49  ;;  %v928_v51 = vmul.f32 %v1294_v21, %v926_v48  ;;  %v1042_v21 = vld [vmem:[#allocation10 + $0xe] sm:$0x1] }
 0x424   :  { %v933_v52 = vrot.slane %v921_v50, %v1707_v7 }
 0x426   :  { %v935_v53 = vadd.f32 %v933_v52, %v928_v51 }
 0x428   :  { %v936_v55 = vmax.f32 %v935_v53, 0.0 }
 0x42a   :  { %v953_v56 = vpack.c.bf16 %v936_v55, %v936_v55 }
 0x42c   :  { %1333 = vmatmul.mubr.bf16.vlgmr.msra.gmra.mrb[8].mxu1 %v953_v56 }
 0x42d   :  { %1352 = vmatprep.mubr.msk.bf16.mxu1 %vm1596_vm0, %v1595_v11  ;;  %1337 = vmatpush3.bf16.msra.mxu1 %v1447_v58 }
 0x42e   :  { %1338 = vmatprep.subr.bf16.mxu1 %v1595_v11 }
 0x431   :  { %1339 = vmatpush3.bf16.msra.mxu1 %v1448_v59 }
 0x432   :  { %1340 = vmatprep.subr.bf16.mxu1 %v1595_v11 }
 0x435   :  { %1341 = vmatpush3.bf16.msra.mxu1 %v1449_v54 }
 0x436   :  { %1342 = vmatprep.subr.bf16.mxu1 %v1595_v11 }
 0x439   :  { %1343 = vmatpush3.bf16.msra.mxu1 %v1450_v57 }
 0x43a   :  { %1344 = vmatprep.subr.bf16.mxu1 %v1595_v11 }
 0x43d   :  { %1345 = vmatpush3.bf16.msra.mxu1 %v1451_v60 }
 0x43e   :  { %1346 = vmatprep.subr.bf16.mxu1 %v1595_v11 }
 0x441   :  { %1347 = vmatpush3.bf16.msra.mxu1 %v1452_v62 }
 0x442   :  { %1348 = vmatprep.subr.bf16.mxu1 %v1595_v11 }
 0x445   :  { %1349 = vmatpush3.bf16.msra.mxu1 %v1453_v61 }
 0x446   :  { %1350 = vmatprep.subr.bf16.mxu1 %v1595_v11 }
 0x449   :  { %1351 = vmatpush3.bf16.msra.mxu1 %v1454_v63 }
 0x4ff   :  { %v1036_v0 = vpop.f32.mrb[8].mxu1 }
 0x500   :  { %v1044_v9 = vrot.slane %v1036_v0, 4  ;;  %v1050_v1 = vmul.f32 %v1036_v0, %v1036_v0  ;;  %v1334_v2 = vpop.f32.mrb[9].mxu1 }
 0x501   :  { %v1039_v3 = vpop.f32.mrb[10].mxu1 }
 0x502   :  { %v1045_v4 = vadd.f32 %v1044_v9, %v1036_v0  ;;  %v1051_v5 = vrot.slane %v1050_v1, 4  ;;  %v1335_v37 = vpop.f32.mrb[11].mxu1 }
 0x504   :  { %v1046_v6 = vrot.slane %v1045_v4, 2  ;;  %v1052_v43 = vadd.f32 %v1051_v5, %v1050_v1 }
 0x506   :  { %v1047_v8 = vadd.f32 %v1046_v6, %v1045_v4  ;;  %v1053_v10 = vrot.slane %v1052_v43, 2 }
 0x508   :  { %v1048_v12 = vrot.slane %v1047_v8, 1  ;;  %v1054_v13 = vadd.f32 %v1053_v10, %v1052_v43 }
 0x50a   :  { %v1049_v14 = vadd.f32 %v1048_v12, %v1047_v8  ;;  %v1055_v15 = vrot.slane %v1054_v13, 1 }
 0x50c   :  { %v1056_v16 = vadd.f32 %v1055_v15, %v1054_v13  ;;  %v1057_v11 = vmul.f32 0.125, %v1049_v14 }
 0x50e   :  { %v1058_v17 = vmul.f32 0.125, %v1056_v16  ;;  %v1059_v18 = vmul.f32 %v1057_v11, %v1057_v11 }
 0x510   :  { %v1060_v19 = vsub.f32 %v1058_v17, %v1059_v18 }
 0x512   :  { %v1061_v20 = vadd.f32 1e-05, %v1060_v19 }
 0x514   :  { %1457 = vrsqrt.f32 %v1061_v20 }
 0x51e   :  { %v1458_v22 = vpop.eup %1457 }
 0x51f   :  { %v1063_v23 = vmul.f32 %v1458_v22, %v1042_v21 }
 0x521   :  { %v1064_v25 = vmul.f32 %v1063_v23, %v1057_v11  ;;  %v1070_v26 = vrot.slane %v1063_v23, %v1707_v7 }
 0x523   :  { %v1065_v27 = vsub.f32 %v1043_v24, %v1064_v25  ;;  %v1072_v29 = vmul.f32 %v1070_v26, %v1036_v0 }
 0x525   :  { %v1077_v31 = vrot.slane %v1065_v27, %v1707_v7 }
 0x527   :  { %v1079_v33 = vadd.f32 %v1077_v31, %v1072_v29 }
 0x529   :  { %v1080_v28 = vmax.f32 %v1079_v33, 0.0 }
 0x52b   :  { %v1097_v30 = vpack.c.bf16 %v1080_v28, %v1080_v28 }
 0x52d   :  { %1353 = vmatmul.mubr.bf16.vlgmr.msra.gmra.mrb[12].mxu1 %v1097_v30 }
 0x600   :  { %v1187_v35 = vpop.f32.mrb[12].mxu1 }
 0x601   :  { %v1188_v41 = vadd.f32 %v1265_v32, %v1187_v35  ;;  %v1354_v34 = vpop.f32.mrb[13].mxu1 }
 0x602   :  { %v1190_v36 = vpop.f32.mrb[14].mxu1 }
 0x603   :  { %1193 = vst [vmem:[#allocation11] sm:$0xff] %v1188_v41  ;;  %v1355_v42 = vpop.f32.mrb[15].mxu1 }
 0x604   :  { %1558 = shalt.err (!%p1555_p8)
}
 0x605   :  { %s1559_s6 = scalar_lea.hbm %s1790_s5, 128 }
 0x606   :  { %p1560_p9 = scmp.ne.s32.totalorder %s1790_s5, %s1559_s6  ;;  %p1563_p10 = scmp.lt.u32.totalorder %s1559_s6, %s1790_s5 }
 0x608   :  { %p1565_p11 = pnand %p1563_p10, %p1560_p9 }
 0x60a   :  { %1568 = shalt.err (!%p1565_p11)
}
 0x60b   :  { %1203 = dma.vmem_to_hbm [thread:$0]  %s1201_s28, 128, %s1790_s5, [#allocation7]  }
 0x60c   :  { %1577 = dma.done.wait [#allocation7], 128  }
 0x60d   :  { %1578 = vsyncadd [#allocation7], 4294967168 }
 0x60e   :  { %1207 = vsyncpa [#allocation6], 1 }
 0x60f   :  { %1208 = vsyncpa [#allocation9], 1 }
 0x610   :  { %1209 = vsyncpa [#allocation7], 1 }
 0x611   :  { %1210 = vsyncmov [#allocation4] }
 0x614   :  { %s1211_s12 = vpop.sfrf %1210 }
 0x615   :  { %p1274_p12 = scmp.ne.s32.totalorder %s1211_s12, 0 }
 0x617   :  { %1215 = shalt.err (%p1274_p12)  }
 0x618   :  { %1217 = vsyncmov [#allocation4 + $0x1] }
 0x61b   :  { %s1218_s13 = vpop.sfrf %1217 }
 0x61c   :  { %p1275_p13 = scmp.ne.s32.totalorder %s1218_s13, 0 }
 0x61e   :  { %1222 = shalt.err (%p1275_p13)  }

</bundles_post_ra>
